<compile_context>
chip_gen: v6e
topology: v6e:2x2x1
jax: 0.10.0
libtpu: 0.0.40
codegen_flags: <defaults>
</compile_context>

<pallas_src>
import functools

import jax
import jax.numpy as jnp
from jax.experimental import pallas as pl
from jax.experimental.pallas import tpu as pltpu

TEMPERATURE = 0.07
BASE_TEMPERATURE = 0.07


def _supcon_tile_kernel(contrast_ref, labels_col_ref, labels_row_ref,
                        loss_ref, valid_ref, *,
                        inv_temperature, temp_over_base, tile_rows):
    """Per-anchor-tile SupCon loss.

    contrast_ref:   [N, D]   full contrast features (resident)
    labels_col_ref: [N, 1]   view-major labels (int32), resident
    labels_row_ref: [1, TR]  labels of this anchor tile (int32)
    loss_ref:       [1, TR]  per-anchor loss (0 for invalid anchors)
    valid_ref:      [1, TR]  1.0 if the anchor has at least one positive
    """
    n = contrast_ref.shape[0]
    tr = tile_rows
    i = pl.program_id(0)
    row_start = pl.multiple_of(i * tr, tr)

    c = contrast_ref[...]                                   # [N, D]
    a = contrast_ref[pl.ds(row_start, tr), :]               # [TR, D] anchor tile
    a = a * inv_temperature                                 # fold 1/T into small operand

    # logits[p, q] = <contrast_p, anchor_{row_start+q}> / T  -> [N, TR], f32 acc
    logits = jax.lax.dot_general(
        c, a, dimension_numbers=(((1,), (1,)), ((), ())),
        preferred_element_type=jnp.float32)

    lbl_c = labels_col_ref[...]                              # [N, 1] int32
    lbl_a = labels_row_ref[...]                              # [1, TR] int32

    # self-contrast mask (global diagonal removed)
    contrast_ids = jax.lax.broadcasted_iota(jnp.int32, (n, 1), 0)
    anchor_ids = row_start + jax.lax.broadcasted_iota(jnp.int32, (1, tr), 1)
    not_diag = (contrast_ids != anchor_ids).astype(jnp.float32)   # [N, TR]

    # positive-pair mask built in-kernel from labels (diagonal excluded)
    pos_mask = jnp.where(lbl_c == lbl_a, not_diag, 0.0)            # [N, TR]

    # numerically-stable log-softmax over the contrast axis (axis 0 here);
    # the max includes the self term, matching torch.max(dim=1)
    logits_max = jnp.max(logits, axis=0, keepdims=True)            # [1, TR]
    shifted = logits - logits_max                                  # [N, TR]
    exp_l = jnp.exp(shifted) * not_diag
    log_denom = jnp.log(jnp.sum(exp_l, axis=0, keepdims=True))     # [1, TR]

    mask_sum = jnp.sum(pos_mask, axis=0, keepdims=True)            # [1, TR]
    valid = mask_sum != 0.0
    safe_mask_sum = jnp.where(valid, mask_sum, 1.0)

    # sum(mask * log_prob) = sum(mask * shifted) - mask_sum * log_denom
    pos_shift_sum = jnp.sum(pos_mask * shifted, axis=0, keepdims=True)
    mean_log_prob_pos = (pos_shift_sum - mask_sum * log_denom) / safe_mask_sum

    loss_row = (-temp_over_base) * mean_log_prob_pos
    loss_ref[...] = jnp.where(valid, loss_row, 0.0)
    valid_ref[...] = valid.astype(jnp.float32)


def _pick_tile_rows(n):
    for tr in (256, 128):
        if n % tr == 0:
            return tr
    return n   # tiny problems: single tile


def debiased_supcon_loss(features, labels, *, temperature=TEMPERATURE,
                         base_temperature=BASE_TEMPERATURE, tile_rows=None):
    """features: [B, V, D] (bf16 or f32); labels: [B] int. Returns scalar loss."""
    if features.ndim < 3:
        raise ValueError("`features` needs to be [bsz, n_views, ...]")
    if features.ndim > 3:
        features = features.reshape(features.shape[0], features.shape[1], -1)
    B, V, D = features.shape
    N = B * V

    if tile_rows is None:
        tile_rows = _pick_tile_rows(N)
    assert N % tile_rows == 0, "N must be divisible by tile_rows"
    assert tile_rows == N or tile_rows % 128 == 0, \
        "tile_rows must equal N or be a multiple of 128"

    # contrast_feature = cat(unbind(features, dim=1), dim=0) -> view-major [N, D]
    contrast = jnp.transpose(features, (1, 0, 2)).reshape(N, D)

    # view-major labels: row r of `contrast` is sample (r mod B)
    labels_vm = jnp.tile(labels.reshape(-1).astype(jnp.int32), V)   # [N]
    labels_col = labels_vm.reshape(N, 1)
    labels_row = labels_vm.reshape(1, N)

    grid = (N // tile_rows,)
    kernel = functools.partial(
        _supcon_tile_kernel,
        inv_temperature=1.0 / float(temperature),
        temp_over_base=float(temperature) / float(base_temperature),
        tile_rows=tile_rows,
    )

    loss_rows, valid_rows = pl.pallas_call(
        kernel,
        out_shape=(
            jax.ShapeDtypeStruct((1, N), jnp.float32),
            jax.ShapeDtypeStruct((1, N), jnp.float32),
        ),
        grid_spec=pltpu.PrefetchScalarGridSpec(
            num_scalar_prefetch=0,
            grid=grid,
            in_specs=[
                pl.BlockSpec((N, D), lambda i: (0, 0)),          # resident contrast
                pl.BlockSpec((N, 1), lambda i: (0, 0)),          # resident labels (col)
                pl.BlockSpec((1, tile_rows), lambda i: (0, i)),  # anchor-label tile
            ],
            out_specs=[
                pl.BlockSpec((1, tile_rows), lambda i: (0, i)),  # lane-dense loss
                pl.BlockSpec((1, tile_rows), lambda i: (0, i)),  # lane-dense valid
            ],
        ),
        compiler_params=pltpu.CompilerParams(
            dimension_semantics=("parallel",),
            vmem_limit_bytes=32 * 1024 * 1024,
        ),
    )(contrast, labels_col, labels_row)

    # mean over valid anchors only (matches the valid_idx filtering in PyTorch)
    num_valid = jnp.sum(valid_rows)
    return jnp.sum(loss_rows) / num_valid


def _reference_loss(features, labels, temperature=TEMPERATURE,
                    base_temperature=BASE_TEMPERATURE):
    """Pure-JAX reference mirroring the PyTorch forward (supervised, mode='all')."""
    B, V, D = features.shape
    N = B * V
    contrast = jnp.transpose(features.astype(jnp.float32), (1, 0, 2)).reshape(N, D)
    labels = labels.reshape(-1, 1)
    mask = jnp.tile((labels == labels.T).astype(jnp.float32), (V, V))
    logits = jnp.matmul(contrast, contrast.T,
                        precision=jax.lax.Precision.HIGHEST) / temperature
    logits = logits - jnp.max(logits, axis=1, keepdims=True)
    logits_mask = 1.0 - jnp.eye(N, dtype=jnp.float32)
    mask = mask * logits_mask
    valid = jnp.sum(mask, axis=1) != 0
    exp_logits = jnp.exp(logits) * logits_mask
    log_prob = logits - jnp.log(jnp.sum(exp_logits, axis=1, keepdims=True))
    mask_sum = jnp.where(valid, jnp.sum(mask, axis=1), 1.0)
    mean_log_prob_pos = jnp.sum(mask * log_prob, axis=1) / mask_sum
    loss_rows = -(temperature / base_temperature) * mean_log_prob_pos
    return jnp.sum(jnp.where(valid, loss_rows, 0.0)) / jnp.sum(valid.astype(jnp.float32))


if __name__ == "__main__":
    key = jax.random.PRNGKey(0)
    kf, kl, kf2, kl2 = jax.random.split(key, 4)

    # Small shape consistent with the module: batch=8, n_views=2, feature_dim=32.
    B, V, D = 8, 2, 32
    feats = jax.random.normal(kf, (B, V, D), dtype=jnp.float32)
    feats = feats / jnp.linalg.norm(feats, axis=-1, keepdims=True)
    labels = jax.random.randint(kl, (B,), 0, 3)

    loss = jax.block_until_ready(debiased_supcon_loss(feats, labels))
    ref = _reference_loss(feats, labels)
    assert jnp.allclose(loss, ref, atol=1e-3, rtol=1e-3), (loss, ref)

    # Multi-tile path: N = 256, tile_rows = 128 -> grid of 2 (exercises the
    # dynamic anchor slice, blocked label row, and lane-dense output tiling).
    B2, V2, D2 = 128, 2, 64
    feats2 = jax.random.normal(kf2, (B2, V2, D2), dtype=jnp.float32)
    feats2 = feats2 / jnp.linalg.norm(feats2, axis=-1, keepdims=True)
    labels2 = jax.random.randint(kl2, (B2,), 0, 8)

    loss2 = jax.block_until_ready(
        debiased_supcon_loss(feats2, labels2, tile_rows=128))
    ref2 = _reference_loss(feats2, labels2)
    assert jnp.allclose(loss2, ref2, atol=1e-3, rtol=1e-3), (loss2, ref2)

    print("KERNEL_OK")
</pallas_src>

<mosaic_0001>
module attributes {stable_mosaic.version = 11 : i64} {
  func.func @_supcon_tile_kernel(%arg0: i32, %arg1: memref<16x32xf32, #tpu.memory_space<vmem>>, %arg2: memref<16x1xi32, #tpu.memory_space<vmem>>, %arg3: memref<1x16xi32, #tpu.memory_space<vmem>>, %arg4: memref<1x16xf32, #tpu.memory_space<vmem>>, %arg5: memref<1x16xf32, #tpu.memory_space<vmem>>) attributes {dimension_semantics = [#tpu.dimension_semantics<parallel>], iteration_bounds = array<i64: 1>, scalar_prefetch = 0 : i64, scratch_operands = 0 : i64, tpu.core_type = #tpu.core_type<tc>, window_params = [{pipeline_mode = #tpu.pipeline_mode<synchronous>, transform_indices = @transform_0, window_bounds = array<i64: 16, 32>}, {pipeline_mode = #tpu.pipeline_mode<synchronous>, transform_indices = @transform_1, window_bounds = array<i64: 16, 1>}, {transform_indices = @transform_2, window_bounds = array<i64: 1, 16>}, {transform_indices = @transform_3, window_bounds = array<i64: 1, 16>}, {transform_indices = @transform_4, window_bounds = array<i64: 1, 16>}]} {
    %c16_i32 = arith.constant 16 : i32
    %0 = arith.muli %arg0, %c16_i32 : i32
    %1 = tpu.assume_multiple %0, 16 : i32
    %c0 = arith.constant 0 : index
    %c0_0 = arith.constant 0 : index
    %2 = vector.load %arg1[%c0, %c0_0] : memref<16x32xf32, #tpu.memory_space<vmem>>, vector<16x32xf32>
    %3 = arith.index_cast %1 : i32 to index
    %c0_1 = arith.constant 0 : index
    %4 = vector.load %arg1[%3, %c0_1] : memref<16x32xf32, #tpu.memory_space<vmem>>, vector<16x32xf32>
    %cst = arith.constant 14.2857141 : f32
    %5 = vector.broadcast %cst : f32 to vector<16x32xf32>
    %6 = arith.mulf %4, %5 : vector<16x32xf32>
    %cst_2 = arith.constant dense<0.000000e+00> : vector<16x16xf32>
    %7 = tpu.matmul %2, %6, %cst_2 {dimension_numbers = #tpu.dot_dimension_numbers<[1], [1], [0], [0], [0, 0, 1, 0], [], []>} : vector<16x32xf32>, vector<16x32xf32>, vector<16x16xf32> -> vector<16x16xf32>
    %c0_3 = arith.constant 0 : index
    %c0_4 = arith.constant 0 : index
    %8 = vector.load %arg2[%c0_3, %c0_4] : memref<16x1xi32, #tpu.memory_space<vmem>>, vector<16x1xi32>
    %c0_5 = arith.constant 0 : index
    %c0_6 = arith.constant 0 : index
    %9 = vector.load %arg3[%c0_5, %c0_6] : memref<1x16xi32, #tpu.memory_space<vmem>>, vector<1x16xi32>
    %10 = tpu.iota {dimensions = array<i32: 0>} : vector<16x1xi32>
    %11 = tpu.iota {dimensions = array<i32: 1>} : vector<1x16xi32>
    %12 = vector.broadcast %1 : i32 to vector<1x16xi32>
    %13 = arith.addi %12, %11 : vector<1x16xi32>
    %14 = vector.broadcast %10 : vector<16x1xi32> to vector<16x16xi32>
    %15 = vector.broadcast %13 : vector<1x16xi32> to vector<16x16xi32>
    %16 = arith.cmpi ne, %14, %15 : vector<16x16xi32>
    %17 = arith.extui %16 : vector<16x16xi1> to vector<16x16xi32>
    %18 = arith.sitofp %17 : vector<16x16xi32> to vector<16x16xf32>
    %19 = vector.broadcast %8 : vector<16x1xi32> to vector<16x16xi32>
    %20 = vector.broadcast %9 : vector<1x16xi32> to vector<16x16xi32>
    %21 = arith.cmpi eq, %19, %20 : vector<16x16xi32>
    %cst_7 = arith.constant 0.000000e+00 : f32
    %22 = vector.broadcast %cst_7 : f32 to vector<16x16xf32>
    %23 = arith.select %21, %18, %22 : vector<16x16xi1>, vector<16x16xf32>
    %cst_8 = arith.constant dense<0xFF800000> : vector<16xf32>
    %24 = vector.multi_reduction <maximumf>, %7, %cst_8 [0] : vector<16x16xf32> to vector<16xf32>
    %25 = vector.shape_cast %24 : vector<16xf32> to vector<1x16xf32>
    %26 = vector.broadcast %25 : vector<1x16xf32> to vector<16x16xf32>
    %27 = arith.subf %7, %26 : vector<16x16xf32>
    %28 = math.exp %27 : vector<16x16xf32>
    %29 = arith.mulf %28, %18 : vector<16x16xf32>
    %cst_9 = arith.constant dense<0.000000e+00> : vector<16xf32>
    %30 = vector.multi_reduction <add>, %29, %cst_9 [0] : vector<16x16xf32> to vector<16xf32>
    %31 = vector.shape_cast %30 : vector<16xf32> to vector<1x16xf32>
    %32 = math.log %31 : vector<1x16xf32>
    %cst_10 = arith.constant dense<0.000000e+00> : vector<16xf32>
    %33 = vector.multi_reduction <add>, %23, %cst_10 [0] : vector<16x16xf32> to vector<16xf32>
    %34 = vector.shape_cast %33 : vector<16xf32> to vector<1x16xf32>
    %cst_11 = arith.constant 0.000000e+00 : f32
    %35 = vector.broadcast %cst_11 : f32 to vector<1x16xf32>
    %36 = arith.cmpf one, %34, %35 : vector<1x16xf32>
    %cst_12 = arith.constant 1.000000e+00 : f32
    %37 = vector.broadcast %cst_12 : f32 to vector<1x16xf32>
    %38 = arith.select %36, %34, %37 : vector<1x16xi1>, vector<1x16xf32>
    %39 = arith.mulf %23, %27 : vector<16x16xf32>
    %cst_13 = arith.constant dense<0.000000e+00> : vector<16xf32>
    %40 = vector.multi_reduction <add>, %39, %cst_13 [0] : vector<16x16xf32> to vector<16xf32>
    %41 = vector.shape_cast %40 : vector<16xf32> to vector<1x16xf32>
    %42 = arith.mulf %34, %32 : vector<1x16xf32>
    %43 = arith.subf %41, %42 : vector<1x16xf32>
    %44 = arith.divf %43, %38 : vector<1x16xf32>
    %cst_14 = arith.constant -1.000000e+00 : f32
    %45 = vector.broadcast %cst_14 : f32 to vector<1x16xf32>
    %46 = arith.mulf %45, %44 : vector<1x16xf32>
    %cst_15 = arith.constant 0.000000e+00 : f32
    %47 = vector.broadcast %cst_15 : f32 to vector<1x16xf32>
    %48 = arith.select %36, %46, %47 : vector<1x16xi1>, vector<1x16xf32>
    %c0_16 = arith.constant 0 : index
    %c0_17 = arith.constant 0 : index
    %49 = vector.load %arg4[%c0_16, %c0_17] : memref<1x16xf32, #tpu.memory_space<vmem>>, vector<1x16xf32>
    tpu.vector_store %arg4[%c0_16, %c0_17], %48 {strides = array<i32>} : memref<1x16xf32, #tpu.memory_space<vmem>>, vector<1x16xf32>,
    %50 = arith.extui %36 : vector<1x16xi1> to vector<1x16xi32>
    %51 = arith.sitofp %50 : vector<1x16xi32> to vector<1x16xf32>
    %c0_18 = arith.constant 0 : index
    %c0_19 = arith.constant 0 : index
    %52 = vector.load %arg5[%c0_18, %c0_19] : memref<1x16xf32, #tpu.memory_space<vmem>>, vector<1x16xf32>
    tpu.vector_store %arg5[%c0_18, %c0_19], %51 {strides = array<i32>} : memref<1x16xf32, #tpu.memory_space<vmem>>, vector<1x16xf32>,
    return
  }
  func.func @transform_0(%arg0: i32) -> (i32, i32) {
    %c0_i32 = arith.constant 0 : i32
    %c0_i32_0 = arith.constant 0 : i32
    %c0_i32_1 = arith.constant 0 : i32
    return %c0_i32, %c0_i32_0 : i32, i32
  }
  func.func @transform_1(%arg0: i32) -> (i32, i32) {
    %c0_i32 = arith.constant 0 : i32
    %c0_i32_0 = arith.constant 0 : i32
    %c0_i32_1 = arith.constant 0 : i32
    return %c0_i32, %c0_i32_0 : i32, i32
  }
  func.func @transform_2(%arg0: i32) -> (i32, i32) {
    %c0_i32 = arith.constant 0 : i32
    %c0_i32_0 = arith.constant 0 : i32
    return %c0_i32, %arg0 : i32, i32
  }
  func.func @transform_3(%arg0: i32) -> (i32, i32) {
    %c0_i32 = arith.constant 0 : i32
    %c0_i32_0 = arith.constant 0 : i32
    return %c0_i32, %arg0 : i32, i32
  }
  func.func @transform_4(%arg0: i32) -> (i32, i32) {
    %c0_i32 = arith.constant 0 : i32
    %c0_i32_0 = arith.constant 0 : i32
    return %c0_i32, %arg0 : i32, i32
  }
}

</mosaic_0001>

<bundles_post_ra>
// kernel: tpu_custom_call.1
= control target key start
LH: loop header
LB: loop body
LE: loop exit
PB: predicated region body
PF: predicated region fallthrough
CT: control target
= control target key end

     0   :  { %10 = vsyncpa [#allocation3], 0  ;;  %vm26_vm0 = vcmask 261120   ;;  %v310_v5 = vmov 0   ;;  %s387_s0 = inlined_call_operand.vmem [shape: f32[16,32], index: 0, kind: input, shape index: {}]   ;;  %s388_s1 = inlined_call_operand.vmem [shape: s32[16,1], index: 1, kind: input, shape index: {}]   ;;  %s389_s2 = inlined_call_operand.vmem [shape: s32[1,16], index: 2, kind: input, shape index: {}]   ;;  %s390_s3 = inlined_call_operand.hbm [shape: f32[1,16], index: 3, kind: output, shape index: {0}]   ;;  %s391_s4 = inlined_call_operand.hbm [shape: f32[1,16], index: 4, kind: output, shape index: {1}]  }
   0x1   :  { %v23_v0 = vld [vmem:[%s387_s0 + $0x8] sm:$0xff]  ;;  %v22_v1 = vld [vmem:[%s387_s0] sm:$0xff]  ;;  %257 = vset.pattern.permute.xlu0 %v310_v5 }
   0x2   :  { %v114_v2 = vld [vmem:[%s388_s1] sm:$0xff]  ;;  %v25_v3 = vmul.f32 14.285714, %v23_v0  ;;  %v24_v4 = vmul.f32 14.285714, %v22_v1  ;;  %250 = vmatprep.mubr.msk.f32.mxu0 %vm26_vm0, %v22_v1 }
   0x3   :  { %131 = vperm.xlu0 %257, %v114_v2  }
   0x4   :  { %11 = vsyncpa [#allocation5], 0  ;;  %246 = vmatprep.subr.msk.mxu0 %vm26_vm0, %v25_v3  ;;  %v115_v6 = vld [vmem:[%s388_s1 + $0x8] sm:$0xff]  ;;  %v117_v7 = vlaneseq  ;;  %v240_v11 = vld [vmem:[%s389_s2] ss:$0 sm:$0xff]  ;;  %v311_v13 = vmov 0.0  }
   0x5   :  { %247 = vmatpush3.xpose.msk.msra.mxu0 %vm26_vm0, %v25_v3  ;;  %vm144_vm4 = vcmask 130048   ;;  %vm201_vm6 = vcmask 122880   ;;  %s312_s1 = smov [#allocation4]  }
   0x6   :  { %248 = vmatprep.subr.msk.mxu0 %vm26_vm0, %v24_v4  ;;  %v118_v8 = vshrl.u32 %v117_v7, 7  ;;  %v121_v9 = vand.u32 127, %v117_v7  ;;  %s222_s2 = sshll.u32 %s312_s1, 4  ;;  %s223_s2 = int_to_ptr.vmem [resolvable:$true] %s222_s2 }
   0x7   :  { %134 = vperm.xlu0 %257, %v115_v6   ;;  %s266_s24 = scalar_lea.vmem %s223_s2, 16  ;;  %s270_s25 = scalar_lea.vmem %s223_s2, 32 }
   0x8   :  { %v119_v10 = vadd.s32 8, %v118_v8  ;;  %vm124_vm1 = vcmp.ne.s32.totalorder %v118_v8, %v121_v9  ;;  %p267_p0 = scmp.ne.s32.totalorder %s223_s2, %s266_s24  ;;  %p271_p1 = scmp.lt.s32.totalorder %s223_s2, %s223_s2 }
   0x9   :  { %249 = vmatpush3.xpose.msk.msra.mxu0 %vm26_vm0, %v24_v4  ;;  %v238_v14 = vsel %vm124_vm1, 1.0, %v311_v13  ;;  %p272_p2 = scmp.lt.s32.totalorder %s270_s25, %s266_s24 }
   0xa   :  { %vm125_vm2 = vcmp.ne.s32.totalorder %v119_v10, %v121_v9 }
   0xb   :  { %v239_v15 = vsel %vm125_vm2, 1.0, %v311_v13  ;;  %p273_p3 = por %p272_p2, %p271_p1 }
   0xc   :  { %251 = vmatmul.mubr.msk.f32.vlgmr.msra.gmra.mxu0 %vm26_vm0, %v23_v0 }
   0xd   :  { %p274_p4 = pnand %p273_p3, %p267_p0 }
  0x7e   :  { %v132_v12 = vpop.permute.xlu0 %131 }
  0x7f   :  { %vm140_vm3 = vcmp.eq.s32.totalorder %v132_v12, %v240_v11 }
  0x80   :  { %v142_v16 = vsel %vm140_vm3, %v238_v14, 0.0 }
  0x81   :  { %v173_v18 = vsel %vm144_vm4, %v142_v16, 0.0 }
  0x82   :  { %v135_v17 = vpop.permute.xlu0 %134 }
  0x83   :  { %vm141_vm5 = vcmp.eq.s32.totalorder %v135_v17, %v240_v11 }
  0x84   :  { %v143_v19 = vsel %vm141_vm5, %v239_v15, 0.0 }
  0x85   :  { %v174_v20 = vsel %vm144_vm4, %v143_v19, 0.0 }
  0x86   :  { %v175_v21 = vadd.f32 %v174_v20, %v173_v18 }
  0x88   :  { %v176_v22 = vrot.slane %v175_v21, 4 }
  0x8a   :  { %v177_v23 = vadd.f32 %v176_v22, %v175_v21 }
  0x8c   :  { %v178_v24 = vrot.slane %v177_v23, 2 }
  0x8e   :  { %v179_v25 = vadd.f32 %v178_v24, %v177_v23 }
  0x90   :  { %v180_v26 = vrot.slane %v179_v25, 1 }
  0x92   :  { %v362_v27 = vadd.f32 %v180_v26, %v179_v25 }
  0x94   :  { %vm182_vm7 = vcmp.ne.f32.partialorder %v362_v27, 0.0 }
  0x95   :  { %v241_v28 = vsel %vm182_vm7, 1.0, %v311_v13 }
  0x96   :  { %205 = vst.msk [vmem:[#allocation4] sm:$0x1] %vm201_vm6, %v241_v28 }
  0x97   :  { %277 = shalt.err (!%p274_p4)
}
  0x98   :  { %225 = dma.vmem_to_hbm [thread:$0]  %s223_s2, 16, %s391_s4, [#allocation5]   ;;  %v183_v0 = vsel %vm182_vm7, %v362_v27, 1.0 }
  0x99   :  { %s313_s4 = smov [#allocation2]  }
  0x9a   :  { %s212_s28 = sshll.u32 %s313_s4, 4  ;;  %s213_s28 = int_to_ptr.vmem [resolvable:$true] %s212_s28 }
  0x9b   :  { %s286_s29 = scalar_lea.vmem %s213_s28, 16  ;;  %s290_s30 = scalar_lea.vmem %s213_s28, 32 }
  0x9c   :  { %p287_p5 = scmp.ne.s32.totalorder %s213_s28, %s286_s29  ;;  %p291_p6 = scmp.lt.s32.totalorder %s213_s28, %s213_s28 }
  0x9d   :  { %p292_p7 = scmp.lt.s32.totalorder %s290_s30, %s286_s29 }
  0x9f   :  { %p293_p8 = por %p292_p7, %p291_p6 }
  0xa1   :  { %p294_p9 = pnand %p293_p8, %p287_p5 }
  0xcc   :  { %v252_v29 = vpop.f32.mrf.mxu0 }
  0xcd   :  { %v146_v31 = vsel %vm144_vm4, %v252_v29, -inf }
  0xce   :  { %v105_v30 = vpop.f32.mrf.mxu0 }
  0xcf   :  { %v145_v32 = vsel %vm144_vm4, %v105_v30, -inf }
  0xd0   :  { %v147_v33 = vmax.f32 %v145_v32, %v146_v31 }
  0xd2   :  { %v148_v34 = vrot.slane %v147_v33, 4 }
  0xd4   :  { %v149_v35 = vmax.f32 %v147_v33, %v148_v34 }
  0xd6   :  { %v150_v36 = vrot.slane %v149_v35, 2 }
  0xd8   :  { %v151_v37 = vmax.f32 %v149_v35, %v150_v36 }
  0xda   :  { %v152_v38 = vrot.slane %v151_v37, 1 }
  0xdc   :  { %v153_v39 = vmax.f32 %v151_v37, %v152_v38 }
  0xde   :  { %v154_v40 = vsub.f32 %v105_v30, %v153_v39  ;;  %v155_v41 = vsub.f32 %v252_v29, %v153_v39 }
  0xe0   :  { %v156_v42 = vmul.f32 1.442695, %v154_v40  ;;  %v158_v43 = vmul.f32 1.442695, %v155_v41  ;;  %v184_v49 = vmul.f32 %v154_v40, %v142_v16  ;;  %v185_v51 = vmul.f32 %v155_v41, %v143_v19 }
  0xe2   :  { %258 = vpow2.f32 %v156_v42  ;;  %v186_v54 = vsel %vm144_vm4, %v184_v49, 0.0  ;;  %v187_v55 = vsel %vm144_vm4, %v185_v51, 0.0 }
  0xe3   :  { %260 = vpow2.f32 %v158_v43  ;;  %v188_v58 = vadd.f32 %v187_v55, %v186_v54 }
  0xe5   :  { %v189_v61 = vrot.slane %v188_v58, 4 }
  0xe7   :  { %v190_v63 = vadd.f32 %v189_v61, %v188_v58 }
  0xe9   :  { %v191_v1 = vrot.slane %v190_v63, 2 }
  0xeb   :  { %v192_v2 = vadd.f32 %v191_v1, %v190_v63 }
  0xed   :  { %v193_v3 = vrot.slane %v192_v2, 1 }
  0xef   :  { %v259_v44 = vpop.eup %258  ;;  %v194_v6 = vadd.f32 %v193_v3, %v192_v2 }
  0xf0   :  { %v261_v45 = vpop.eup %260  ;;  %v160_v46 = vmul.f32 %v259_v44, %v238_v14 }
  0xf1   :  { %v161_v47 = vmul.f32 %v261_v45, %v239_v15 }
  0xf2   :  { %v162_v48 = vsel %vm144_vm4, %v160_v46, 0.0 }
  0xf3   :  { %v163_v50 = vsel %vm144_vm4, %v161_v47, 0.0 }
  0xf4   :  { %v164_v52 = vadd.f32 %v163_v50, %v162_v48 }
  0xf6   :  { %v165_v53 = vrot.slane %v164_v52, 4 }
  0xf8   :  { %v166_v56 = vadd.f32 %v165_v53, %v164_v52 }
  0xfa   :  { %v167_v57 = vrot.slane %v166_v56, 2 }
  0xfc   :  { %v168_v59 = vadd.f32 %v167_v57, %v166_v56 }
  0xfe   :  { %v169_v60 = vrot.slane %v168_v59, 1 }
 0x100   :  { %v170_v62 = vadd.f32 %v169_v60, %v168_v59 }
 0x102   :  { %262 = vlog2.f32 %v170_v62 }
 0x103   :  { %264 = vrcp.f32 %v183_v0 }
 0x10f   :  { %v263_v4 = vpop.eup %262 }
 0x110   :  { %v172_v5 = vmul.f32 0.6931472, %v263_v4  ;;  %v265_v9 = vpop.eup %264 }
 0x112   :  { %v195_v7 = vmul.f32 %v362_v27, %v172_v5 }
 0x114   :  { %v196_v8 = vsub.f32 %v194_v6, %v195_v7 }
 0x116   :  { %v198_v10 = vmul.f32 %v265_v9, %v196_v8 }
 0x118   :  { %v199_v11 = vmul.f32 -1.0, %v198_v10 }
 0x11a   :  { %v200_v12 = vsel %vm182_vm7, %v199_v11, 0.0 }
 0x11b   :  { %202 = vst.msk [vmem:[#allocation2] sm:$0x1] %vm201_vm6, %v200_v12 }
 0x11c   :  { %297 = shalt.err (!%p294_p9)
}
 0x11d   :  { %215 = dma.vmem_to_hbm [thread:$0]  %s213_s28, 16, %s390_s3, [#allocation3]  }
 0x11e   :  { %306 = dma.done.wait [#allocation3], 16  }
 0x11f   :  { %307 = vsyncadd [#allocation3], 4294967280 }
 0x120   :  { %308 = dma.done.wait [#allocation5], 16  }
 0x121   :  { %309 = vsyncadd [#allocation5], 4294967280 }
 0x122   :  { %232 = vsyncpa [#allocation3], 1 }
 0x123   :  { %233 = vsyncpa [#allocation5], 1 }

</bundles_post_ra>
